<compile_context>
chip_gen: v7x
topology: tpu7x:2x2x1
jax: 0.10.0
libtpu: 0.0.40
codegen_flags: <defaults>
</compile_context>

<pallas_src>
import jax
import jax.numpy as jnp
from jax.experimental import pallas as pl
from jax.experimental.pallas import tpu as pltpu


def _subsample_kernel(x_ref, o_ref):
    # x_ref: (TILE, 1, Wo, s)  -- only row-offset 0 of each s-row group was DMA'd.
    # o_ref: (TILE, Wo)
    x = x_ref[...]                 # full load of the (already row-subsampled) block
    o_ref[...] = x[:, 0, :, 0]     # keep column-offset 0 of each s-col group


def _pick_tile(rows, wo, s, itemsize):
    """Pick a leading-axis tile size; keep each (double-buffered) input block <= ~8 MiB."""
    # Conservative VMEM estimate of one leading row of the input block,
    # accounting for (8,128) tiling/padding of the last two dims.
    sub = -(-wo // 8) * 8
    lane = -(-s // 128) * 128
    bytes_per_row = sub * lane * max(int(itemsize), 1)
    budget = 8 * 1024 * 1024          # per input buffer (x2 for double buffering)
    max_tile = max(8, budget // max(bytes_per_row, 1))
    max_tile = min(max_tile, 2048)
    if rows <= max_tile:
        return rows, rows             # single block covering everything
    tile = max((max_tile // 8) * 8, 8)   # multiple of 8 -> valid sublane block size
    rows_pad = -(-rows // tile) * tile
    return tile, rows_pad


def subsampling(x, kernel_size, stride=None):
    """Pallas implementation of SubSampling.forward for NCHW input."""
    s = stride if stride is not None else kernel_size
    n, c, h, w = x.shape
    ho = (h - kernel_size) // s + 1
    wo = (w - kernel_size) // s + 1

    # Crop (or zero-pad in rare k<s corner cases) so spatial dims factor exactly
    # as (ho, s) x (wo, s). Selected elements sit at indices <= (ho-1)*s /
    # (wo-1)*s, so any zero padding is never selected -> semantics preserved.
    hc, wc = ho * s, wo * s
    if h >= hc:
        x = x[:, :, :hc, :]
    else:
        x = jnp.pad(x, ((0, 0), (0, 0), (0, hc - h), (0, 0)))
    if w >= wc:
        x = x[:, :, :, :wc]
    else:
        x = jnp.pad(x, ((0, 0), (0, 0), (0, 0), (0, wc - w)))

    rows = n * c * ho
    # Free (row-major) reshape: axis 1 = row offset within an s-row group,
    # axis 3 = column offset within an s-col group.
    x5 = x.reshape(rows, s, wo, s)

    tile, rows_pad = _pick_tile(rows, wo, s, x.dtype.itemsize)
    if rows_pad > rows:
        x5 = jnp.pad(x5, ((0, rows_pad - rows), (0, 0), (0, 0), (0, 0)))

    out = pl.pallas_call(
        _subsample_kernel,
        out_shape=jax.ShapeDtypeStruct((rows_pad, wo), x.dtype),
        grid=(rows_pad // tile,),
        in_specs=[
            # Block size 1 + block index 0 on axis 1 => only rows oh*s are DMA'd
            # from HBM (s-fold read-traffic reduction). Last two block dims equal
            # the full array dims, satisfying the (8,128) blocking rule.
            pl.BlockSpec((tile, 1, wo, s), lambda i: (i, 0, 0, 0)),
        ],
        out_specs=pl.BlockSpec((tile, wo), lambda i: (i, 0)),
        compiler_params=pltpu.CompilerParams(
            dimension_semantics=("parallel",),      # independent iterations -> megacore-shardable
            vmem_limit_bytes=32 * 1024 * 1024,      # fits v5e/v6e/v7x budgets
        ),
    )(x5)

    return out[:rows].reshape(n, c, ho, wo)


if __name__ == "__main__":
    key = jax.random.PRNGKey(0)

    # Small shapes consistent with an NCHW conv-style input.
    N, C, H, W = 2, 4, 16, 16
    kernel_size = 4          # SubSampling(kernel_size=4) -> stride defaults to 4
    stride = None            # default: stride = kernel_size

    x = jax.random.normal(key, (N, C, H, W), dtype=jnp.float32)

    out = subsampling(x, kernel_size, stride)
    out = jax.block_until_ready(out)

    # Pure-JAX reference of the PyTorch semantics.
    s = kernel_size if stride is None else stride
    ho = (H - kernel_size) // s + 1
    wo = (W - kernel_size) // s + 1
    ref = x[:, :, : (ho - 1) * s + 1 : s, : (wo - 1) * s + 1 : s]

    assert out.shape == (N, C, ho, wo), (out.shape, (N, C, ho, wo))
    assert jnp.allclose(out, ref), "Pallas SubSampling mismatch vs reference"

    print("KERNEL_OK")
</pallas_src>

<mosaic_0001>
module attributes {stable_mosaic.version = 11 : i64} {
  func.func @_subsample_kernel(%arg0: i32, %arg1: memref<32x1x4x4xf32, #tpu.memory_space<vmem>>, %arg2: memref<32x4xf32, #tpu.memory_space<vmem>>) attributes {dimension_semantics = [#tpu.dimension_semantics<parallel>], iteration_bounds = array<i64: 1>, scalar_prefetch = 0 : i64, scratch_operands = 0 : i64, tpu.core_type = #tpu.core_type<tc>, window_params = [{transform_indices = @transform_0, window_bounds = array<i64: 32, 1, 4, 4>}, {transform_indices = @transform_1, window_bounds = array<i64: 32, 4>}]} {
    %c0 = arith.constant 0 : index
    %c0_0 = arith.constant 0 : index
    %c0_1 = arith.constant 0 : index
    %c0_2 = arith.constant 0 : index
    %0 = vector.load %arg1[%c0, %c0_0, %c0_1, %c0_2] : memref<32x1x4x4xf32, #tpu.memory_space<vmem>>, vector<32x1x4x4xf32>
    %1 = vector.extract_strided_slice %0 {offsets = [0, 0, 0, 0], sizes = [32, 1, 4, 1], strides = [1, 1, 1, 1]} : vector<32x1x4x4xf32> to vector<32x1x4x1xf32>
    %2 = vector.shape_cast %1 : vector<32x1x4x1xf32> to vector<32x4xf32>
    %c0_3 = arith.constant 0 : index
    %c0_4 = arith.constant 0 : index
    %3 = vector.load %arg2[%c0_3, %c0_4] : memref<32x4xf32, #tpu.memory_space<vmem>>, vector<32x4xf32>
    tpu.vector_store %arg2[%c0_3, %c0_4], %2 {strides = array<i32>} : memref<32x4xf32, #tpu.memory_space<vmem>>, vector<32x4xf32>,
    return
  }
  func.func @transform_0(%arg0: i32) -> (i32, i32, i32, i32) {
    %c0_i32 = arith.constant 0 : i32
    %c0_i32_0 = arith.constant 0 : i32
    %c0_i32_1 = arith.constant 0 : i32
    %c0_i32_2 = arith.constant 0 : i32
    return %arg0, %c0_i32, %c0_i32_0, %c0_i32_1 : i32, i32, i32, i32
  }
  func.func @transform_1(%arg0: i32) -> (i32, i32) {
    %c0_i32 = arith.constant 0 : i32
    %c0_i32_0 = arith.constant 0 : i32
    return %arg0, %c0_i32 : i32, i32
  }
}

</mosaic_0001>

<bundles_post_ra>
// kernel: tpu_custom_call.1
= control target key start
LH: loop header
LB: loop body
LE: loop exit
PB: predicated region body
PF: predicated region fallthrough
CT: control target
= control target key end

     0   :  { %v518_v2 = vmov 0   ;;  %vm463_vm0 = vcmask 1041409   ;;  %vm465_vm1 = vcmask 1042434   ;;  %vm467_vm2 = vcmask 1043459   ;;  %s703_s0 = inlined_call_operand.vmem [shape: f32[32,4,4,4], index: 0, kind: input, shape index: {}]   ;;  %s704_s1 = inlined_call_operand.vmem [shape: f32[32,4], index: 1, kind: output, shape index: {}]  }
   0x1   :  { %v27_v0 = vld [vmem:[%s703_s0 + $0x20] sm:$0xf]  ;;  %517 = vset.pattern.permute.xlu1 %v518_v2  ;;  %516 = vset.pattern.permute.xlu0 %v518_v2  ;;  %v29_v3 = vld [vmem:[%s703_s0 + $0x30] sm:$0xf]  ;;  %vm469_vm3 = vcmask 1044484   ;;  %vm471_vm4 = vcmask 1045509  }
   0x2   :  { %v23_v1 = vld [vmem:[%s703_s0] sm:$0xf]  ;;  %28 = vst [vmem:[#allocation2 + $0x8] sm:$0xf] %v27_v0  ;;  %v25_v4 = vld [vmem:[%s703_s0 + $0x10] sm:$0xf] }
   0x3   :  { %24 = vst [vmem:[#allocation2] sm:$0xf] %v23_v1  ;;  %v33_v5 = vld [vmem:[%s703_s0 + $0x50] sm:$0xf]  ;;  %30 = vst [vmem:[#allocation2 + $0xc] sm:$0xf] %v29_v3  ;;  %v333_v1 = vlaneseq }
   0x4   :  { %26 = vst [vmem:[#allocation2 + $0x4] sm:$0xf] %v25_v4  ;;  %34 = vst [vmem:[#allocation2 + $0x14] sm:$0xf] %v33_v5  ;;  %v31_v6 = vld [vmem:[%s703_s0 + $0x40] sm:$0xf] }
   0x5   :  { %v37_v7 = vld [vmem:[%s703_s0 + $0x70] sm:$0xf]  ;;  %v35_v8 = vld [vmem:[%s703_s0 + $0x60] sm:$0xf]  ;;  %32 = vst [vmem:[#allocation2 + $0x10] sm:$0xf] %v31_v6 }
   0x6   :  { %38 = vst [vmem:[#allocation2 + $0x1c] sm:$0xf] %v37_v7  ;;  %36 = vst [vmem:[#allocation2 + $0x18] sm:$0xf] %v35_v8  ;;  %v41_v9 = vld [vmem:[%s703_s0 + $0x90] sm:$0xf] }
   0x7   :  { %v39_v10 = vld [vmem:[%s703_s0 + $0x80] sm:$0xf]  ;;  %v45_v11 = vld [vmem:[%s703_s0 + $0xb0] sm:$0xf]  ;;  %42 = vst [vmem:[#allocation2 + $0x24] sm:$0xf] %v41_v9 }
   0x8   :  { %40 = vst [vmem:[#allocation2 + $0x20] sm:$0xf] %v39_v10  ;;  %46 = vst [vmem:[#allocation2 + $0x2c] sm:$0xf] %v45_v11  ;;  %v43_v12 = vld [vmem:[%s703_s0 + $0xa0] sm:$0xf] }
   0x9   :  { %v49_v13 = vld [vmem:[%s703_s0 + $0xd0] sm:$0xf]  ;;  %v47_v14 = vld [vmem:[%s703_s0 + $0xc0] sm:$0xf]  ;;  %44 = vst [vmem:[#allocation2 + $0x28] sm:$0xf] %v43_v12 }
   0xa   :  { %50 = vst [vmem:[#allocation2 + $0x34] sm:$0xf] %v49_v13  ;;  %48 = vst [vmem:[#allocation2 + $0x30] sm:$0xf] %v47_v14  ;;  %v57_v15 = vld [vmem:[%s703_s0 + $0x110] sm:$0xf] }
   0xb   :  { %v55_v16 = vld [vmem:[%s703_s0 + $0x100] sm:$0xf]  ;;  %v73_v17 = vld [vmem:[%s703_s0 + $0x190] sm:$0xf]  ;;  %58 = vst [vmem:[#allocation2 + $0x44] sm:$0xf] %v57_v15 }
   0xc   :  { %56 = vst [vmem:[#allocation2 + $0x40] sm:$0xf] %v55_v16  ;;  %74 = vst [vmem:[#allocation2 + $0x64] sm:$0xf] %v73_v17  ;;  %v71_v18 = vld [vmem:[%s703_s0 + $0x180] sm:$0xf] }
   0xd   :  { %v75_v19 = vld [vmem:[%s703_s0 + $0x1a0] sm:$0xf]  ;;  %72 = vst [vmem:[#allocation2 + $0x60] sm:$0xf] %v71_v18  ;;  %v77_v21 = vld [vmem:[%s703_s0 + $0x1b0] sm:$0xf] }
   0xe   :  { %v59_v20 = vld [vmem:[%s703_s0 + $0x120] sm:$0xf]  ;;  %76 = vst [vmem:[#allocation2 + $0x68] sm:$0xf] %v75_v19  ;;  %v61_v22 = vld [vmem:[%s703_s0 + $0x130] sm:$0xf] }
   0xf   :  { %60 = vst [vmem:[#allocation2 + $0x48] sm:$0xf] %v59_v20  ;;  %v79_v23 = vld [vmem:[%s703_s0 + $0x1c0] sm:$0xf]  ;;  %v175_v24 = vld [vmem:[#allocation2 + $0x8] sm:$0xf] }
  0x10   :  { %v173_v25 = vld [vmem:[#allocation2] sm:$0xf]  ;;  %78 = vst [vmem:[#allocation2 + $0x6c] sm:$0xf] %v77_v21  ;;  %62 = vst [vmem:[#allocation2 + $0x4c] sm:$0xf] %v61_v22  ;;  %244 = vperm.xlu1 %517, %v175_v24  }
  0x11   :  { %80 = vst [vmem:[#allocation2 + $0x70] sm:$0xf] %v79_v23  ;;  %v63_v26 = vld [vmem:[%s703_s0 + $0x140] sm:$0xf]  ;;  %238 = vperm.xlu0 %516, %v173_v25   ;;  %v176_v27 = vld [vmem:[#allocation2 + $0xc] sm:$0xf] }
  0x12   :  { %64 = vst [vmem:[#allocation2 + $0x50] sm:$0xf] %v63_v26  ;;  %v174_v28 = vld [vmem:[#allocation2 + $0x4] sm:$0xf]  ;;  %v178_v29 = vld [vmem:[#allocation2 + $0x14] sm:$0xf] }
  0x13   :  { %v177_v30 = vld [vmem:[#allocation2 + $0x10] sm:$0xf]  ;;  %v180_v31 = vld [vmem:[#allocation2 + $0x1c] sm:$0xf]  ;;  %v179_v32 = vld [vmem:[#allocation2 + $0x18] sm:$0xf] }
  0x14   :  { %247 = vperm.xlu1 %517, %v176_v27   ;;  %v81_v33 = vld [vmem:[%s703_s0 + $0x1d0] sm:$0xf]  ;;  %v67_v35 = vld [vmem:[%s703_s0 + $0x160] sm:$0xf]  ;;  %v182_v41 = vld [vmem:[#allocation2 + $0x24] sm:$0xf] }
  0x15   :  { %241 = vperm.xlu0 %516, %v174_v28   ;;  %v65_v34 = vld [vmem:[%s703_s0 + $0x150] sm:$0xf]  ;;  %82 = vst [vmem:[#allocation2 + $0x74] sm:$0xf] %v81_v33  ;;  %v51_v36 = vld [vmem:[%s703_s0 + $0xe0] sm:$0xf] }
  0x16   :  { %66 = vst [vmem:[#allocation2 + $0x54] sm:$0xf] %v65_v34  ;;  %v53_v37 = vld [vmem:[%s703_s0 + $0xf0] sm:$0xf]  ;;  %68 = vst [vmem:[#allocation2 + $0x58] sm:$0xf] %v67_v35 }
  0x17   :  { %52 = vst [vmem:[#allocation2 + $0x38] sm:$0xf] %v51_v36  ;;  %54 = vst [vmem:[#allocation2 + $0x3c] sm:$0xf] %v53_v37  ;;  %v83_v38 = vld [vmem:[%s703_s0 + $0x1e0] sm:$0xf] }
  0x18   :  { %253 = vperm.xlu1 %517, %v178_v29   ;;  %v85_v39 = vld [vmem:[%s703_s0 + $0x1f0] sm:$0xf]  ;;  %84 = vst [vmem:[#allocation2 + $0x78] sm:$0xf] %v83_v38  ;;  %v181_v42 = vld [vmem:[#allocation2 + $0x20] sm:$0xf] }
  0x19   :  { %250 = vperm.xlu0 %516, %v177_v30   ;;  %v69_v40 = vld [vmem:[%s703_s0 + $0x170] sm:$0xf]  ;;  %86 = vst [vmem:[#allocation2 + $0x7c] sm:$0xf] %v85_v39  ;;  %v184_v43 = vld [vmem:[#allocation2 + $0x2c] sm:$0xf] }
  0x1a   :  { %70 = vst [vmem:[#allocation2 + $0x5c] sm:$0xf] %v69_v40  ;;  %v183_v44 = vld [vmem:[#allocation2 + $0x28] sm:$0xf]  ;;  %v186_v45 = vld [vmem:[#allocation2 + $0x34] sm:$0xf] }
  0x1b   :  { %v185_v46 = vld [vmem:[#allocation2 + $0x30] sm:$0xf]  ;;  %v190_v47 = vld [vmem:[#allocation2 + $0x44] sm:$0xf]  ;;  %v189_v48 = vld [vmem:[#allocation2 + $0x40] sm:$0xf] }
  0x1c   :  { %259 = vperm.xlu1 %517, %v180_v31   ;;  %v198_v49 = vld [vmem:[#allocation2 + $0x64] sm:$0xf]  ;;  %v197_v50 = vld [vmem:[#allocation2 + $0x60] sm:$0xf]  ;;  %v199_v51 = vld [vmem:[#allocation2 + $0x68] sm:$0xf] }
  0x1d   :  { %256 = vperm.xlu0 %516, %v179_v32   ;;  %v191_v52 = vld [vmem:[#allocation2 + $0x48] sm:$0xf]  ;;  %v200_v53 = vld [vmem:[#allocation2 + $0x6c] sm:$0xf]  ;;  %v201_v55 = vld [vmem:[#allocation2 + $0x70] sm:$0xf] }
  0x1e   :  { %v192_v54 = vld [vmem:[#allocation2 + $0x4c] sm:$0xf]  ;;  %v193_v56 = vld [vmem:[#allocation2 + $0x50] sm:$0xf]  ;;  %v202_v57 = vld [vmem:[#allocation2 + $0x74] sm:$0xf] }
  0x1f   :  { %v194_v58 = vld [vmem:[#allocation2 + $0x54] sm:$0xf]  ;;  %v195_v59 = vld [vmem:[#allocation2 + $0x58] sm:$0xf]  ;;  %v188_v61 = vld [vmem:[#allocation2 + $0x3c] sm:$0xf] }
  0x20   :  { %265 = vperm.xlu1 %517, %v182_v41   ;;  %v187_v60 = vld [vmem:[#allocation2 + $0x38] sm:$0xf]  ;;  %v204_v63 = vld [vmem:[#allocation2 + $0x7c] sm:$0xf]  ;;  %v334_v2 = vand.u32 127, %v333_v1  ;;  %v336_v3 = vshrl.u32 %v333_v1, 7 }
  0x21   :  { %262 = vperm.xlu0 %516, %v181_v42   ;;  %v203_v62 = vld [vmem:[#allocation2 + $0x78] sm:$0xf]  ;;  %v196_v0 = vld [vmem:[#allocation2 + $0x5c] sm:$0xf]  ;;  %vm473_vm5 = vcmask 1046534   ;;  %vm475_vm6 = vcmask 1047559  }
  0x22   :  { %v625_v6 = vsub.s32 %v334_v2, %v336_v3  ;;  %vm502_vm7 = vcmask 31744  }
  0x24   :  { %271 = vperm.xlu1 %517, %v184_v43  }
  0x25   :  { %268 = vperm.xlu0 %516, %v183_v44  }
  0x28   :  { %277 = vperm.xlu1 %517, %v186_v45  }
  0x29   :  { %274 = vperm.xlu0 %516, %v185_v46  }
  0x2c   :  { %289 = vperm.xlu1 %517, %v190_v47  }
  0x2d   :  { %286 = vperm.xlu0 %516, %v189_v48  }
  0x30   :  { %313 = vperm.xlu1 %517, %v198_v49  }
  0x31   :  { %310 = vperm.xlu0 %516, %v197_v50  }
  0x34   :  { %316 = vperm.xlu1 %517, %v199_v51  }
  0x35   :  { %292 = vperm.xlu0 %516, %v191_v52  }
  0x38   :  { %319 = vperm.xlu1 %517, %v200_v53  }
  0x39   :  { %295 = vperm.xlu0 %516, %v192_v54  }
  0x3c   :  { %322 = vperm.xlu1 %517, %v201_v55  }
  0x3d   :  { %298 = vperm.xlu0 %516, %v193_v56  }
  0x40   :  { %325 = vperm.xlu1 %517, %v202_v57  }
  0x41   :  { %301 = vperm.xlu0 %516, %v194_v58  }
  0x44   :  { %304 = vperm.xlu1 %517, %v195_v59  }
  0x45   :  { %280 = vperm.xlu0 %516, %v187_v60  }
  0x48   :  { %283 = vperm.xlu1 %517, %v188_v61  }
  0x49   :  { %328 = vperm.xlu0 %516, %v203_v62  }
  0x4c   :  { %331 = vperm.xlu1 %517, %v204_v63  }
  0x4d   :  { %307 = vperm.xlu0 %516, %v196_v0  }
  0x8f   :  { %v245_v4 = vpop.permute.xlu1 %244 }
  0x90   :  { %v239_v5 = vpop.permute.xlu0 %238  ;;  %v346_v11 = vrot.slane %v245_v4, %v625_v6 }
  0x91   :  { %v338_v9 = vrot.slane %v239_v5, %v625_v6 }
  0x93   :  { %v248_v7 = vpop.permute.xlu1 %247 }
  0x94   :  { %v242_v8 = vpop.permute.xlu0 %241  ;;  %v350_v12 = vrot.slane %v248_v7, %v625_v6 }
  0x95   :  { %v342_v10 = vrot.slane %v242_v8, %v625_v6 }
  0x97   :  { %v464_v13 = vsel %vm463_vm0, %v342_v10, %v338_v9  ;;  %v254_v15 = vpop.permute.xlu1 %253 }
  0x98   :  { %v466_v14 = vsel %vm465_vm1, %v346_v11, %v464_v13  ;;  %v251_v16 = vpop.permute.xlu0 %250  ;;  %v358_v19 = vrot.slane %v254_v15, %v625_v6 }
  0x99   :  { %v468_v17 = vsel %vm467_vm2, %v350_v12, %v466_v14  ;;  %v354_v18 = vrot.slane %v251_v16, %v625_v6 }
  0x9b   :  { %v470_v20 = vsel %vm469_vm3, %v354_v18, %v468_v17  ;;  %v260_v21 = vpop.permute.xlu1 %259 }
  0x9c   :  { %v257_v22 = vpop.permute.xlu0 %256  ;;  %v366_v23 = vrot.slane %v260_v21, %v625_v6  ;;  %v472_v25 = vsel %vm471_vm4, %v358_v19, %v470_v20 }
  0x9d   :  { %v362_v24 = vrot.slane %v257_v22, %v625_v6 }
  0x9f   :  { %v474_v26 = vsel %vm473_vm5, %v362_v24, %v472_v25  ;;  %v266_v28 = vpop.permute.xlu1 %265 }
  0xa0   :  { %v476_v27 = vsel %vm475_vm6, %v366_v23, %v474_v26  ;;  %v263_v29 = vpop.permute.xlu0 %262  ;;  %v374_v42 = vrot.slane %v266_v28, %v625_v6 }
  0xa1   :  { %503 = vst.msk [vmem:[%s704_s1] sm:$0xff] %vm502_vm7, %v476_v27  ;;  %v370_v43 = vrot.slane %v263_v29, %v625_v6 }
  0xa3   :  { %v272_v30 = vpop.permute.xlu1 %271  ;;  %v477_v47 = vsel %vm463_vm0, %v374_v42, %v370_v43 }
  0xa4   :  { %v269_v31 = vpop.permute.xlu0 %268  ;;  %v382_v48 = vrot.slane %v272_v30, %v625_v6 }
  0xa5   :  { %v378_v44 = vrot.slane %v269_v31, %v625_v6 }
  0xa7   :  { %v278_v32 = vpop.permute.xlu1 %277  ;;  %v478_v49 = vsel %vm465_vm1, %v378_v44, %v477_v47 }
  0xa8   :  { %v275_v33 = vpop.permute.xlu0 %274  ;;  %v479_v53 = vsel %vm467_vm2, %v382_v48, %v478_v49  ;;  %v390_v54 = vrot.slane %v278_v32, %v625_v6 }
  0xa9   :  { %v386_v50 = vrot.slane %v275_v33, %v625_v6 }
  0xab   :  { %v290_v34 = vpop.permute.xlu1 %289  ;;  %v480_v55 = vsel %vm469_vm3, %v386_v50, %v479_v53 }
  0xac   :  { %v287_v35 = vpop.permute.xlu0 %286  ;;  %v406_v56 = vrot.slane %v290_v34, %v625_v6  ;;  %v481_v3 = vsel %vm471_vm4, %v390_v54, %v480_v55 }
  0xad   :  { %v402_v57 = vrot.slane %v287_v35, %v625_v6 }
  0xaf   :  { %v314_v36 = vpop.permute.xlu1 %313  ;;  %v484_v4 = vsel %vm463_vm0, %v406_v56, %v402_v57 }
  0xb0   :  { %v311_v37 = vpop.permute.xlu0 %310  ;;  %v438_v58 = vrot.slane %v314_v36, %v625_v6 }
  0xb1   :  { %v434_v59 = vrot.slane %v311_v37, %v625_v6 }
  0xb3   :  { %v317_v38 = vpop.permute.xlu1 %316  ;;  %v491_v5 = vsel %vm463_vm0, %v438_v58, %v434_v59 }
  0xb4   :  { %v293_v39 = vpop.permute.xlu0 %292  ;;  %v442_v62 = vrot.slane %v317_v38, %v625_v6 }
  0xb5   :  { %v410_v63 = vrot.slane %v293_v39, %v625_v6 }
  0xb6   :  { %v492_v11 = vsel %vm465_vm1, %v442_v62, %v491_v5 }
  0xb7   :  { %v320_v40 = vpop.permute.xlu1 %319  ;;  %v485_v15 = vsel %vm465_vm1, %v410_v63, %v484_v4 }
  0xb8   :  { %v296_v41 = vpop.permute.xlu0 %295  ;;  %v446_v1 = vrot.slane %v320_v40, %v625_v6 }
  0xb9   :  { %v414_v2 = vrot.slane %v296_v41, %v625_v6 }
  0xba   :  { %v493_v19 = vsel %vm467_vm2, %v446_v1, %v492_v11 }
  0xbb   :  { %v323_v45 = vpop.permute.xlu1 %322  ;;  %v486_v20 = vsel %vm467_vm2, %v414_v2, %v485_v15 }
  0xbc   :  { %v299_v46 = vpop.permute.xlu0 %298  ;;  %v450_v7 = vrot.slane %v323_v45, %v625_v6 }
  0xbd   :  { %v418_v8 = vrot.slane %v299_v46, %v625_v6 }
  0xbe   :  { %v494_v22 = vsel %vm469_vm3, %v450_v7, %v493_v19 }
  0xbf   :  { %v326_v51 = vpop.permute.xlu1 %325  ;;  %v487_v23 = vsel %vm469_vm3, %v418_v8, %v486_v20 }
  0xc0   :  { %v302_v52 = vpop.permute.xlu0 %301  ;;  %v454_v12 = vrot.slane %v326_v51, %v625_v6 }
  0xc1   :  { %v422_v13 = vrot.slane %v302_v52, %v625_v6 }
  0xc2   :  { %v495_v26 = vsel %vm471_vm4, %v454_v12, %v494_v22 }
  0xc3   :  { %v305_v60 = vpop.permute.xlu1 %304  ;;  %v488_v27 = vsel %vm471_vm4, %v422_v13, %v487_v23 }
  0xc4   :  { %v281_v61 = vpop.permute.xlu0 %280  ;;  %v426_v16 = vrot.slane %v305_v60, %v625_v6 }
  0xc5   :  { %v394_v0 = vrot.slane %v281_v61, %v625_v6 }
  0xc6   :  { %v489_v30 = vsel %vm473_vm5, %v426_v16, %v488_v27 }
  0xc7   :  { %v284_v9 = vpop.permute.xlu1 %283  ;;  %v482_v17 = vsel %vm473_vm5, %v394_v0, %v481_v3 }
  0xc8   :  { %v329_v10 = vpop.permute.xlu0 %328  ;;  %v398_v14 = vrot.slane %v284_v9, %v625_v6 }
  0xc9   :  { %v458_v18 = vrot.slane %v329_v10, %v625_v6 }
  0xca   :  { %v483_v21 = vsel %vm475_vm6, %v398_v14, %v482_v17 }
  0xcb   :  { %504 = vst.msk [vmem:[%s704_s1 + $0x8] sm:$0xff] %vm502_vm7, %v483_v21  ;;  %v332_v24 = vpop.permute.xlu1 %331  ;;  %v496_v31 = vsel %vm473_vm5, %v458_v18, %v495_v26 }
  0xcc   :  { %v308_v25 = vpop.permute.xlu0 %307  ;;  %v462_v28 = vrot.slane %v332_v24, %v625_v6 }
  0xcd   :  { %v430_v29 = vrot.slane %v308_v25, %v625_v6 }
  0xce   :  { %v497_v32 = vsel %vm475_vm6, %v462_v28, %v496_v31 }
  0xcf   :  { %v490_v33 = vsel %vm475_vm6, %v430_v29, %v489_v30  ;;  %506 = vst.msk [vmem:[%s704_s1 + $0x18] sm:$0xff] %vm502_vm7, %v497_v32 }
  0xd0   :  { %505 = vst.msk [vmem:[%s704_s1 + $0x10] sm:$0xff] %vm502_vm7, %v490_v33 }

</bundles_post_ra>
